<compile_context>
chip_gen: v6e
topology: v6e:2x2x1
jax: 0.10.0
libtpu: 0.0.40
codegen_flags: <defaults>
</compile_context>

<pallas_src>
import jax
import jax.numpy as jnp
from jax import lax
from jax.experimental import pallas as pl
from jax.experimental.pallas import tpu as pltpu


# ----------------------------------------------------------------------------
# Fused kernel: (Linear+ReLU) x 2 -> low-rank bilinear pooling, block_b batch
# elements per grid step.  Weights stay resident in VMEM (constant index_map).
# ----------------------------------------------------------------------------
def _bcnet_fused_kernel(v_ref, q_ref, wv_ref, bv_ref, wq_ref, bq_ref,
                        hmat_ref, hbias_ref, o_ref):
    block_b, NV, Dv = v_ref.shape
    _, NQ, Dq = q_ref.shape
    H, Kp = hmat_ref.shape
    NVQ = NV * NQ

    # FCNet v_net / q_net: bf16 MXU operands, f32 accumulation + bias + ReLU.
    v = v_ref[...].reshape(block_b * NV, Dv).astype(jnp.bfloat16)
    q = q_ref[...].reshape(block_b * NQ, Dq).astype(jnp.bfloat16)
    v_feat = jnp.maximum(
        jnp.dot(v, wv_ref[...], preferred_element_type=jnp.float32)
        + bv_ref[...], 0.0)                               # [block_b*NV, Kp] f32
    q_feat = jnp.maximum(
        jnp.dot(q, wq_ref[...], preferred_element_type=jnp.float32)
        + bq_ref[...], 0.0)                               # [block_b*NQ, Kp] f32

    # joint[b, v, q, k] = v_feat[b, v, k] * q_feat[b, q, k]
    v_feat = v_feat.reshape(block_b, NV, Kp)
    q_feat = q_feat.reshape(block_b, NQ, Kp)
    joint = (v_feat[:, :, None, :] * q_feat[:, None, :, :]
             ).reshape(block_b * NVQ, Kp).astype(jnp.bfloat16)

    # logits[h, b*v*q] = sum_k h_mat[h, k] * joint[b*v*q, k]  -- one MXU matmul
    # with a block_b*128-lane-dense result; bias folded into the epilogue.
    logits = lax.dot_general(
        hmat_ref[...], joint,
        dimension_numbers=(((1,), (1,)), ((), ())),
        preferred_element_type=jnp.float32)               # [H, block_b*NVQ]
    logits = logits + hbias_ref[...]                      # [H, 1] broadcasts

    # Rearrange to batch-major rows (b, h) via lane-slice + sublane-concat so
    # the store is one unmasked, lane-dense (block_b*H, NVQ) slab.
    rows = [logits[:, i * NVQ:(i + 1) * NVQ] for i in range(block_b)]
    o_ref[...] = jnp.concatenate(rows, axis=0) if block_b > 1 else rows[0]


def _choose_block_b(batch, target=8):
    """Largest block <= target keeping >= 2 grid steps (v7x has 2 TensorCores)."""
    bb = max(1, min(target, batch))
    while bb > 1 and pl.cdiv(batch, bb) < 2:
        bb = max(1, bb // 2)
    return bb


# ----------------------------------------------------------------------------
# One-time parameter prep (outside the jitted forward): pad K up to a multiple
# of 128 (padded bias / h_mat columns are zero and ReLU(0)=0, so exact) and
# cast the MXU-side weights to bf16.  Biases stay f32 for the f32 epilogue.
# ----------------------------------------------------------------------------
def prepare_params(params):
    w_v, b_v = params["w_v"], params["b_v"]
    w_q, b_q = params["w_q"], params["b_q"]
    h_mat, h_bias = params["h_mat"], params["h_bias"]
    K = w_v.shape[1]
    Kp = ((K + 127) // 128) * 128
    pad = Kp - K
    if pad:
        w_v = jnp.pad(w_v, ((0, 0), (0, pad)))
        b_v = jnp.pad(b_v, ((0, 0), (0, pad)))
        w_q = jnp.pad(w_q, ((0, 0), (0, pad)))
        b_q = jnp.pad(b_q, ((0, 0), (0, pad)))
        h_mat = jnp.pad(h_mat, ((0, 0), (0, pad)))
    return {
        "w_v": w_v.astype(jnp.bfloat16), "b_v": b_v.astype(jnp.float32),
        "w_q": w_q.astype(jnp.bfloat16), "b_q": b_q.astype(jnp.float32),
        "h_mat": h_mat.astype(jnp.bfloat16),
        "h_bias": h_bias.astype(jnp.float32),
    }


# ----------------------------------------------------------------------------
# BCNet forward (h_out <= 32 branch, eval mode).
# ----------------------------------------------------------------------------
@jax.jit
def bcnet_forward(v, q, prepped):
    B, NV, v_dim = v.shape
    _, NQ, q_dim = q.shape
    w_v, b_v = prepped["w_v"], prepped["b_v"]
    w_q, b_q = prepped["w_q"], prepped["b_q"]
    h_mat, h_bias = prepped["h_mat"], prepped["h_bias"]
    Kp = w_v.shape[1]
    H = h_mat.shape[0]
    NVQ = NV * NQ

    block_b = _choose_block_b(B)
    n_blocks = pl.cdiv(B, block_b)
    B_pad = n_blocks * block_b
    if B_pad != B:                       # zero-pad batch; rows sliced off below
        v = jnp.pad(v, ((0, B_pad - B), (0, 0), (0, 0)))
        q = jnp.pad(q, ((0, B_pad - B), (0, 0), (0, 0)))

    flops = B_pad * (2 * NV * v_dim * Kp          # v linear
                     + 2 * NQ * q_dim * Kp        # q linear
                     + NV * NQ * Kp               # joint outer product
                     + 2 * H * Kp * NV * NQ)      # bilinear matmul
    bytes_accessed = (4 * B_pad * (NV * v_dim + NQ * q_dim + H * NVQ)
                      + 2 * (v_dim + q_dim + H) * Kp      # bf16 weights
                      + 4 * (2 * Kp + H))                  # f32 biases

    out = pl.pallas_call(
        _bcnet_fused_kernel,
        out_shape=jax.ShapeDtypeStruct((n_blocks, block_b * H, NVQ), jnp.float32),
        grid=(n_blocks,),
        in_specs=[
            pl.BlockSpec((block_b, NV, v_dim), lambda b: (b, 0, 0)),
            pl.BlockSpec((block_b, NQ, q_dim), lambda b: (b, 0, 0)),
            # weights / biases: constant index_map -> resident across the grid
            pl.BlockSpec((v_dim, Kp), lambda b: (0, 0)),
            pl.BlockSpec((1, Kp), lambda b: (0, 0)),
            pl.BlockSpec((q_dim, Kp), lambda b: (0, 0)),
            pl.BlockSpec((1, Kp), lambda b: (0, 0)),
            pl.BlockSpec((H, Kp), lambda b: (0, 0)),
            pl.BlockSpec((H, 1), lambda b: (0, 0)),
        ],
        out_specs=pl.BlockSpec((pl.Squeezed(), block_b * H, NVQ),
                               lambda b: (b, 0, 0)),
        compiler_params=pltpu.CompilerParams(
            dimension_semantics=("parallel",),
            vmem_limit_bytes=48 * 1024 * 1024),   # headroom below v7x 64 MiB
        cost_estimate=pl.CostEstimate(flops=flops, transcendentals=0,
                                      bytes_accessed=bytes_accessed),
    )(v, q, w_v, b_v, w_q, b_q, h_mat, h_bias)

    out = out.reshape(B_pad, H, NV, NQ)           # pure reshape, no transpose
    return out[:B] if B_pad != B else out


def init_params(key, v_dim, q_dim, h_dim, h_out, k):
    K = h_dim * k
    k1, k2, k3, k4, k5, k6 = jax.random.split(key, 6)
    return {
        "w_v": 0.1 * jax.random.normal(k1, (v_dim, K), jnp.float32),
        "b_v": 0.1 * jax.random.normal(k2, (1, K), jnp.float32),
        "w_q": 0.1 * jax.random.normal(k3, (q_dim, K), jnp.float32),
        "b_q": 0.1 * jax.random.normal(k4, (1, K), jnp.float32),
        # PyTorch: nn.Parameter(torch.Tensor(1, h_out, 1, K).normal_())
        "h_mat": jax.random.normal(k5, (h_out, K), jnp.float32),
        # PyTorch: nn.Parameter(torch.Tensor(1, h_out, 1, 1).normal_())
        "h_bias": jax.random.normal(k6, (h_out, 1), jnp.float32),
    }


def reference_forward(v, q, params):
    v_feat = jnp.maximum(v @ params["w_v"] + params["b_v"][0], 0.0)
    q_feat = jnp.maximum(q @ params["w_q"] + params["b_q"][0], 0.0)
    logits = jnp.einsum("hk,bvk,bqk->bhvq", params["h_mat"], v_feat, q_feat)
    return logits + params["h_bias"].reshape(1, -1, 1, 1)


if __name__ == "__main__":
    # Small, BAN-consistent shapes (block_b=2 -> grid=(2,), 8x256 MXU output,
    # (8, 128) lane-dense output slab per step).
    B, NV, NQ = 4, 16, 8
    v_dim, q_dim, h_dim, h_out, k = 32, 32, 32, 4, 3

    key = jax.random.PRNGKey(0)
    kp, kv, kq = jax.random.split(key, 3)
    params = init_params(kp, v_dim, q_dim, h_dim, h_out, k)
    prepped = prepare_params(params)        # one-time: pad K->Kp, cast to bf16
    v = jax.random.normal(kv, (B, NV, v_dim), jnp.float32)
    q = jax.random.normal(kq, (B, NQ, q_dim), jnp.float32)

    out = jax.block_until_ready(bcnet_forward(v, q, prepped))

    ref = reference_forward(v, q, params)
    assert out.shape == (B, h_out, NV, NQ), out.shape
    # bf16 MXU operands -> loosened tolerance vs the f32 reference.
    max_err = float(jnp.max(jnp.abs(out - ref)))
    assert jnp.allclose(out, ref, rtol=5e-2, atol=1e-1), max_err

    # TODO(synk): other BCNet branches (h_out is None, h_out > 32),
    # forward_with_weights (+ AvgPool1d k-pooling) and training-mode dropout
    # are not exercised here; only the standard eval-mode h_out <= c path.
    print("KERNEL_OK")
</pallas_src>

<mosaic_0001>
module attributes {stable_mosaic.version = 11 : i64} {
  func.func @_bcnet_fused_kernel(%arg0: i32, %arg1: memref<2x16x32xf32, #tpu.memory_space<vmem>>, %arg2: memref<2x8x32xf32, #tpu.memory_space<vmem>>, %arg3: memref<32x128xbf16, #tpu.memory_space<vmem>>, %arg4: memref<1x128xf32, #tpu.memory_space<vmem>>, %arg5: memref<32x128xbf16, #tpu.memory_space<vmem>>, %arg6: memref<1x128xf32, #tpu.memory_space<vmem>>, %arg7: memref<4x128xbf16, #tpu.memory_space<vmem>>, %arg8: memref<4x1xf32, #tpu.memory_space<vmem>>, %arg9: memref<1x8x128xf32, #tpu.memory_space<vmem>>) attributes {dimension_semantics = [#tpu.dimension_semantics<parallel>], iteration_bounds = array<i64: 2>, scalar_prefetch = 0 : i64, scratch_operands = 0 : i64, tpu.core_type = #tpu.core_type<tc>, window_params = [{transform_indices = @transform_0, window_bounds = array<i64: 2, 16, 32>}, {transform_indices = @transform_1, window_bounds = array<i64: 2, 8, 32>}, {pipeline_mode = #tpu.pipeline_mode<synchronous>, transform_indices = @transform_2, window_bounds = array<i64: 32, 128>}, {pipeline_mode = #tpu.pipeline_mode<synchronous>, transform_indices = @transform_3, window_bounds = array<i64: 1, 128>}, {pipeline_mode = #tpu.pipeline_mode<synchronous>, transform_indices = @transform_4, window_bounds = array<i64: 32, 128>}, {pipeline_mode = #tpu.pipeline_mode<synchronous>, transform_indices = @transform_5, window_bounds = array<i64: 1, 128>}, {pipeline_mode = #tpu.pipeline_mode<synchronous>, transform_indices = @transform_6, window_bounds = array<i64: 4, 128>}, {pipeline_mode = #tpu.pipeline_mode<synchronous>, transform_indices = @transform_7, window_bounds = array<i64: 4, 1>}, {transform_indices = @transform_8, window_bounds = array<i64: 1, 8, 128>}]} {
    %c0 = arith.constant 0 : index
    %c0_0 = arith.constant 0 : index
    %c0_1 = arith.constant 0 : index
    %0 = vector.load %arg1[%c0, %c0_0, %c0_1] : memref<2x16x32xf32, #tpu.memory_space<vmem>>, vector<2x16x32xf32>
    %1 = vector.shape_cast %0 : vector<2x16x32xf32> to vector<32x32xf32>
    %2 = arith.truncf %1 : vector<32x32xf32> to vector<32x32xbf16>
    %c0_2 = arith.constant 0 : index
    %c0_3 = arith.constant 0 : index
    %c0_4 = arith.constant 0 : index
    %3 = vector.load %arg2[%c0_2, %c0_3, %c0_4] : memref<2x8x32xf32, #tpu.memory_space<vmem>>, vector<2x8x32xf32>
    %4 = vector.shape_cast %3 : vector<2x8x32xf32> to vector<16x32xf32>
    %5 = arith.truncf %4 : vector<16x32xf32> to vector<16x32xbf16>
    %c0_5 = arith.constant 0 : index
    %c0_6 = arith.constant 0 : index
    %6 = vector.load %arg3[%c0_5, %c0_6] : memref<32x128xbf16, #tpu.memory_space<vmem>>, vector<32x128xbf16>
    %cst = arith.constant dense<0.000000e+00> : vector<32x128xf32>
    %7 = tpu.matmul %2, %6, %cst {dimension_numbers = #tpu.dot_dimension_numbers<[1], [0], [0], [1], [0, 0, 1, 1], [], []>} : vector<32x32xbf16>, vector<32x128xbf16>, vector<32x128xf32> -> vector<32x128xf32>
    %c0_7 = arith.constant 0 : index
    %c0_8 = arith.constant 0 : index
    %8 = vector.load %arg4[%c0_7, %c0_8] : memref<1x128xf32, #tpu.memory_space<vmem>>, vector<1x128xf32>
    %9 = vector.broadcast %8 : vector<1x128xf32> to vector<32x128xf32>
    %10 = arith.addf %7, %9 : vector<32x128xf32>
    %cst_9 = arith.constant 0.000000e+00 : f32
    %11 = vector.broadcast %cst_9 : f32 to vector<32x128xf32>
    %12 = arith.maximumf %10, %11 : vector<32x128xf32>
    %c0_10 = arith.constant 0 : index
    %c0_11 = arith.constant 0 : index
    %13 = vector.load %arg5[%c0_10, %c0_11] : memref<32x128xbf16, #tpu.memory_space<vmem>>, vector<32x128xbf16>
    %cst_12 = arith.constant dense<0.000000e+00> : vector<16x128xf32>
    %14 = tpu.matmul %5, %13, %cst_12 {dimension_numbers = #tpu.dot_dimension_numbers<[1], [0], [0], [1], [0, 0, 1, 1], [], []>} : vector<16x32xbf16>, vector<32x128xbf16>, vector<16x128xf32> -> vector<16x128xf32>
    %c0_13 = arith.constant 0 : index
    %c0_14 = arith.constant 0 : index
    %15 = vector.load %arg6[%c0_13, %c0_14] : memref<1x128xf32, #tpu.memory_space<vmem>>, vector<1x128xf32>
    %16 = vector.broadcast %15 : vector<1x128xf32> to vector<16x128xf32>
    %17 = arith.addf %14, %16 : vector<16x128xf32>
    %cst_15 = arith.constant 0.000000e+00 : f32
    %18 = vector.broadcast %cst_15 : f32 to vector<16x128xf32>
    %19 = arith.maximumf %17, %18 : vector<16x128xf32>
    %20 = vector.shape_cast %12 : vector<32x128xf32> to vector<2x16x128xf32>
    %21 = vector.shape_cast %19 : vector<16x128xf32> to vector<2x8x128xf32>
    %22 = vector.shape_cast %20 : vector<2x16x128xf32> to vector<2x16x1x128xf32>
    %23 = vector.shape_cast %21 : vector<2x8x128xf32> to vector<2x1x8x128xf32>
    %24 = vector.broadcast %22 : vector<2x16x1x128xf32> to vector<2x16x8x128xf32>
    %25 = vector.broadcast %23 : vector<2x1x8x128xf32> to vector<2x16x8x128xf32>
    %26 = arith.mulf %24, %25 : vector<2x16x8x128xf32>
    %27 = vector.shape_cast %26 : vector<2x16x8x128xf32> to vector<256x128xf32>
    %28 = arith.truncf %27 : vector<256x128xf32> to vector<256x128xbf16>
    %c0_16 = arith.constant 0 : index
    %c0_17 = arith.constant 0 : index
    %29 = vector.load %arg7[%c0_16, %c0_17] : memref<4x128xbf16, #tpu.memory_space<vmem>>, vector<4x128xbf16>
    %cst_18 = arith.constant dense<0.000000e+00> : vector<4x256xf32>
    %30 = tpu.matmul %29, %28, %cst_18 {dimension_numbers = #tpu.dot_dimension_numbers<[1], [1], [0], [0], [0, 0, 1, 0], [], []>} : vector<4x128xbf16>, vector<256x128xbf16>, vector<4x256xf32> -> vector<4x256xf32>
    %c0_19 = arith.constant 0 : index
    %c0_20 = arith.constant 0 : index
    %31 = vector.load %arg8[%c0_19, %c0_20] : memref<4x1xf32, #tpu.memory_space<vmem>>, vector<4x1xf32>
    %32 = vector.broadcast %31 : vector<4x1xf32> to vector<4x256xf32>
    %33 = arith.addf %30, %32 : vector<4x256xf32>
    %34 = vector.extract_strided_slice %33 {offsets = [0, 0], sizes = [4, 128], strides = [1, 1]} : vector<4x256xf32> to vector<4x128xf32>
    %35 = vector.extract_strided_slice %33 {offsets = [0, 128], sizes = [4, 128], strides = [1, 1]} : vector<4x256xf32> to vector<4x128xf32>
    %36 = tpu.concatenate %34, %35 in 0 : vector<4x128xf32>, vector<4x128xf32> -> vector<8x128xf32>
    %c0_21 = arith.constant 0 : index
    %c0_22 = arith.constant 0 : index
    %c0_23 = arith.constant 0 : index
    %37 = vector.load %arg9[%c0_21, %c0_22, %c0_23] : memref<1x8x128xf32, #tpu.memory_space<vmem>>, vector<1x8x128xf32>
    %38 = vector.shape_cast %37 : vector<1x8x128xf32> to vector<8x128xf32>
    %39 = vector.shape_cast %36 : vector<8x128xf32> to vector<1x8x128xf32>
    tpu.vector_store %arg9[%c0_21, %c0_22, %c0_23], %39 {strides = array<i32>} : memref<1x8x128xf32, #tpu.memory_space<vmem>>, vector<1x8x128xf32>,
    return
  }
  func.func @transform_0(%arg0: i32) -> (i32, i32, i32) {
    %c0_i32 = arith.constant 0 : i32
    %c0_i32_0 = arith.constant 0 : i32
    %c0_i32_1 = arith.constant 0 : i32
    return %arg0, %c0_i32, %c0_i32_0 : i32, i32, i32
  }
  func.func @transform_1(%arg0: i32) -> (i32, i32, i32) {
    %c0_i32 = arith.constant 0 : i32
    %c0_i32_0 = arith.constant 0 : i32
    %c0_i32_1 = arith.constant 0 : i32
    return %arg0, %c0_i32, %c0_i32_0 : i32, i32, i32
  }
  func.func @transform_2(%arg0: i32) -> (i32, i32) {
    %c0_i32 = arith.constant 0 : i32
    %c0_i32_0 = arith.constant 0 : i32
    %c0_i32_1 = arith.constant 0 : i32
    return %c0_i32, %c0_i32_0 : i32, i32
  }
  func.func @transform_3(%arg0: i32) -> (i32, i32) {
    %c0_i32 = arith.constant 0 : i32
    %c0_i32_0 = arith.constant 0 : i32
    %c0_i32_1 = arith.constant 0 : i32
    return %c0_i32, %c0_i32_0 : i32, i32
  }
  func.func @transform_4(%arg0: i32) -> (i32, i32) {
    %c0_i32 = arith.constant 0 : i32
    %c0_i32_0 = arith.constant 0 : i32
    %c0_i32_1 = arith.constant 0 : i32
    return %c0_i32, %c0_i32_0 : i32, i32
  }
  func.func @transform_5(%arg0: i32) -> (i32, i32) {
    %c0_i32 = arith.constant 0 : i32
    %c0_i32_0 = arith.constant 0 : i32
    %c0_i32_1 = arith.constant 0 : i32
    return %c0_i32, %c0_i32_0 : i32, i32
  }
  func.func @transform_6(%arg0: i32) -> (i32, i32) {
    %c0_i32 = arith.constant 0 : i32
    %c0_i32_0 = arith.constant 0 : i32
    %c0_i32_1 = arith.constant 0 : i32
    return %c0_i32, %c0_i32_0 : i32, i32
  }
  func.func @transform_7(%arg0: i32) -> (i32, i32) {
    %c0_i32 = arith.constant 0 : i32
    %c0_i32_0 = arith.constant 0 : i32
    %c0_i32_1 = arith.constant 0 : i32
    return %c0_i32, %c0_i32_0 : i32, i32
  }
  func.func @transform_8(%arg0: i32) -> (i32, i32, i32) {
    %c0_i32 = arith.constant 0 : i32
    %c0_i32_0 = arith.constant 0 : i32
    %c0_i32_1 = arith.constant 0 : i32
    return %arg0, %c0_i32, %c0_i32_0 : i32, i32, i32
  }
}

</mosaic_0001>

<bundles_post_ra>
// kernel: bcnet_forward.1
= control target key start
LH: loop header
LB: loop body
LE: loop exit
PB: predicated region body
PF: predicated region fallthrough
CT: control target
= control target key end

     0   :  { %s1872_s0 = inlined_call_operand.hbm [shape: f32[4,16,32], index: 0, kind: input, shape index: {}]   ;;  %s1873_s1 = inlined_call_operand.hbm [shape: f32[4,8,32], index: 1, kind: input, shape index: {}]   ;;  %s1874_s2 = inlined_call_operand.vmem [shape: bf16[32,128], index: 2, kind: input, shape index: {}]   ;;  %s1875_s3 = inlined_call_operand.vmem [shape: f32[1,128], index: 3, kind: input, shape index: {}]   ;;  %s1876_s4 = inlined_call_operand.hbm [shape: bf16[32,128], index: 4, kind: input, shape index: {}]   ;;  %s1877_s5 = inlined_call_operand.hbm [shape: f32[1,128], index: 5, kind: input, shape index: {}]   ;;  %s1878_s6 = inlined_call_operand.hbm [shape: bf16[4,128], index: 6, kind: input, shape index: {}]   ;;  %s1879_s7 = inlined_call_operand.vmem [shape: f32[4,1], index: 7, kind: input, shape index: {}]   ;;  %s1880_s8 = inlined_call_operand.vmem [shape: f32[2,8,128], index: 8, kind: output, shape index: {}]  }
   0x1   :  { %1883 = sst [smem:[#allocation14_spill]] %s1872_s0 }
   0x2   :  { %1884 = sst [smem:[#allocation15_spill]] %s1876_s4 }
   0x3   :  { %1885 = sst [smem:[#allocation16_spill]] %s1877_s5 }
   0x4   :  { %13 = vsyncpa [#allocation3], 0 }
   0x5   :  { %15 = vsyncpa [#allocation3 + $0x1], 0 }
   0x6   :  { %16 = vsyncpa [#allocation5], 0 }
   0x7   :  { %18 = vsyncpa [#allocation5 + $0x1], 0 }
   0x8   :  { %19 = vsyncpa [#allocation8], 0  ;;  %s1549_s27 = smov 0   ;;  %s1551_s28 = smov 0  }
   0x9   :  { %s1553_s29 = smov 0   ;;  %s1555_s30 = smov 0  }
   0xa LB: > { %s1568_s9 = sadd.s32 4294967295, %s1489_s30   ;;  %p45_p0 = scmp.ne.s32.totalorder %s1481_s28, %s1477_s27  ;;  %s1489_s30 = sphi %s1555_s30, %s1902_s30   ;;  %s1485_s29 = sphi %s1553_s29, %s1901_s29   ;;  %s1481_s28 = sphi %s1551_s28, %s1900_s28   ;;  %s1477_s27 = sphi %s1549_s27, %s1899_s27  }
   0xb   : > { %p1881_p1 = scmp.eq.s32.totalorder %s1568_s9, 0  ;;  %p1147_p2 = scmp.ge.s32.totalorder %s1489_s30, 1 }
   0xc   : > { %p234_p3 = scmp.lt.s32.totalorder %s1489_s30, 3  ;;  %s1491_s12 = smov [#allocation6]  }
   0xd   : > { %p1576_p4 = por %p1881_p1, %p45_p0  ;;  %s252_s13 = sshll.u32 %s1491_s12, 4  ;;  %s253_s13 = int_to_ptr.vmem [resolvable:$true] %s252_s13 }
   0xe   : > { %p1580_p5 = pnand %p1147_p2, %p234_p3  ;;  %s1492_s15 = smov [#allocation7]  }
   0xf   : > { %s1886_s10 = scalar_select %p1576_p4, 1, 0 }
  0x10   : > { %p1237_p6 = pneg %p1580_p5  ;;  %s266_s16 = sshll.u32 %s1492_s15, 4  ;;  %s267_s16 = int_to_ptr.vmem [resolvable:$true] %s266_s16 }
  0x11   : > { %s1493_s17 = smov [#allocation9]   ;;  %s1320_s19 = scalar_lea.vmem %s253_s13, 256 }
  0x12   : > { %p1588_p7 = pnand %p1237_p6, %p1881_p1  ;;  %s277_s18 = sshll.u32 %s1493_s17, 4  ;;  %s278_s18 = int_to_ptr.vmem [resolvable:$true] %s277_s18 }
  0x13   : > { %p1321_p9 = scmp.ne.s32.totalorder %s253_s13, %s1320_s19  ;;  %p1328_p12 = scmp.lt.s32.totalorder %s253_s13, %s253_s13 }
  0x14   : > { %p1311_p8 = pneg %p1588_p7  ;;  %p1329_p13 = scmp.lt.s32.totalorder %s1320_s19, %s1320_s19 }
  0x16   : > { %p1323_p10 = pnand %p1321_p9, %p1311_p8  ;;  %p1330_p0 = por %p1329_p13, %p1328_p12 }
  0x18   : > { %p1324_p11 = pneg %p1323_p10 }
  0x1a   : > { %p1331_p2 = pnand %p1330_p0, %p1324_p11 }
  0x1c   : > { %1334 = shalt.err (!%p1331_p2)
}
  0x1d   : > { %s1494_s20 = smov 64   ;;  %s1495_s21 = smov 4  }
  0x1e   : > { %s1889_s4 = sld [smem:[#allocation15_spill]]  ;;  %s1346_s24 = scalar_lea.vmem %s267_s16, 16 }
  0x1f   : > { %p1347_p3 = scmp.ne.s32.totalorder %s267_s16, %s1346_s24  ;;  %s1353_s25 = scalar_lea.vmem %s267_s16, 32 }
  0x20   : > { %p1354_p10 = scmp.lt.s32.totalorder %s267_s16, %s267_s16  ;;  %p1355_p12 = scmp.lt.s32.totalorder %s1353_s25, %s1346_s24 }
  0x21   : > { %p1349_p6 = pnand %p1347_p3, %p1311_p8 }
  0x22   : > { %p1356_p11 = por %p1355_p12, %p1354_p10 }
  0x23   : > { %p1350_p9 = pneg %p1349_p6 }
  0x24   : > { %1240 = dma.hbm_to_vmem [thread:$0]  (!%p1588_p7), %s1889_s4, 256, %s253_s13, [#allocation5], %s1494_s20, %s1494_s20, %s1495_s21  }
  0x25   : > { %p1357_p13 = pnand %p1356_p11, %p1350_p9 }
  0x27   : > { %1360 = shalt.err (!%p1357_p13)
}
  0x28   : > { %s1890_s5 = sld [smem:[#allocation16_spill]]  ;;  %s1372_s12 = scalar_lea.vmem %s278_s18, 32 }
  0x29   : > { %p1373_p0 = scmp.ne.s32.totalorder %s278_s18, %s1372_s12  ;;  %p1380_p6 = scmp.lt.s32.totalorder %s278_s18, %s278_s18 }
  0x2a   : > { %p1381_p1 = scmp.lt.s32.totalorder %s1372_s12, %s1372_s12 }
  0x2b   : > { %p1375_p2 = pnand %p1373_p0, %p1311_p8 }
  0x2c   : > { %p1382_p4 = por %p1381_p1, %p1380_p6 }
  0x2d   : > { %p1376_p3 = pneg %p1375_p2 }
  0x2e   : > { %1243 = dma.hbm_to_vmem [thread:$0]  (!%p1588_p7), %s1890_s5, 16, %s267_s16, [#allocation8]  }
  0x2f   : > { %p1383_p10 = pnand %p1382_p4, %p1376_p3 }
  0x31   : > { %1386 = shalt.err (!%p1383_p10)
}
  0x32   : > { %1246 = dma.hbm_to_vmem [thread:$0]  (!%p1588_p7), %s1878_s6, 32, %s278_s18, [#allocation8]  }
  0x33   : > { %s1619_s16 = sadd.s32 1, %s1489_s30   ;;  %s32_s14 = sadd.s32 1, %s1485_s29 }
  0x34   : > { %s29_s17 = ssub.s32 %s1489_s30, %s1619_s16  ;;  %p39_p4 = scmp.ne.s32.totalorder %s1485_s29, %s1481_s28 }
  0x35   : > { %p30_p1 = scmp.eq.s32.totalorder %s29_s17, 0  ;;  %p40_p8 = scmp.eq.s32.totalorder %s1489_s30, 0 }
  0x36   : > { %p1257_p9 = scmp.lt.s32.totalorder %s1489_s30, 2  ;;  %s1632_s20 = sand.u32 1, %s1485_s29  }
  0x37   : > { %s1629_s19 = scalar_select %p30_p1, %s1485_s29, %s32_s14  }
  0x38   : > { %p41_p12 = por %p40_p8, %p39_p4  ;;  %s1152_s21 = sshll.u32 %s1632_s20, 5 }
  0x39   : > { %s1178_s22 = sshll.u32 %s1489_s30, 9  ;;  %s1891_s0 = sld [smem:[#allocation14_spill]] }
  0x3a   : > { %s295_s25 = scalar_lea.vmem [#allocation2], %s1152_s21  ;;  %p1643_p7 = pnand %p1257_p9, %p41_p12 }
  0x3b   : > { %s303_s26 = sshll.u32 %s295_s25, 4  ;;  %s292_s13 = scalar_lea.sflag [#allocation3], %s1632_s20  ;;  %s1641_s26 = int_to_ptr.vmem [resolvable:$true] %s303_s26 }
  0x3c   : > { %p1389_p13 = pneg %p1643_p7 }
  0x3f   : > { %s1639_s24 = scalar_lea.hbm %s1891_s0, %s1178_s22  ;;  %s1392_s21 = scalar_lea.hbm %s1891_s0, 1024 }
  0x40   : > { %s1387_s15 = scalar_lea.hbm %s1639_s24, 512  ;;  %p1393_p3 = scmp.lt.s32.totalorder %s1639_s24, %s1891_s0 }
  0x41   : > { %p1388_p11 = scmp.ne.s32.totalorder %s1639_s24, %s1387_s15  ;;  %p1394_p6 = scmp.lt.s32.totalorder %s1392_s21, %s1387_s15 }
  0x43   : > { %p1390_p0 = pnand %p1389_p13, %p1388_p11  ;;  %p1395_p10 = por %p1394_p6, %p1393_p3 }
  0x45   : > { %p1391_p2 = pneg %p1390_p0 }
  0x47   : > { %p1396_p1 = pnand %p1395_p10, %p1391_p2 }
  0x49   : > { %1399 = shalt.err (!%p1396_p1)
}
  0x4a   : > { %s1400_s23 = scalar_lea.vmem %s1641_s26, 512  ;;  %s1496_s25 = smov [#allocation2]  }
  0x4b   : > { %p1401_p4 = scmp.ne.s32.totalorder %s1641_s26, %s1400_s23  ;;  %s1405_s17 = sshll.u32 %s1496_s25, 4  ;;  %s1406_s17 = int_to_ptr.vmem [resolvable:$false] %s1405_s17 }
  0x4c   : > { %s1407_s14 = scalar_lea.vmem %s1406_s17, 1024  ;;  %p1408_p12 = scmp.lt.s32.totalorder %s1641_s26, %s1406_s17 }
  0x4d   : > { %p1403_p8 = pnand %p1401_p4, %p1389_p13  ;;  %p1409_p11 = scmp.lt.s32.totalorder %s1407_s14, %s1400_s23 }
  0x4f   : > { %p1404_p9 = pneg %p1403_p8  ;;  %p1410_p0 = por %p1409_p11, %p1408_p12 }
  0x51   : > { %p1411_p3 = pnand %p1410_p0, %p1404_p9 }
  0x53   : > { %1414 = shalt.err (!%p1411_p3)
}
  0x54   : > { %s1497_s15 = smov 128   ;;  %s1498_s21 = smov 8  }
  0x55   : > { %1250 = dma.hbm_to_vmem [thread:$0]  (!%p1643_p7), %s1639_s24, 512, %s1641_s26, %s292_s13, %s1497_s15, %s1497_s15, %s1498_s21  }
  0x56   : > { %s1156_s22 = sshll.u32 %s1632_s20, 4  ;;  %s1179_s18 = sshll.u32 %s1489_s30, 8 }
  0x57   : > { %s1683_s17 = scalar_lea.hbm %s1873_s1, %s1179_s18  ;;  %s317_s14 = scalar_lea.vmem [#allocation4], %s1156_s22 }
  0x58   : > { %s324_s12 = sshll.u32 %s317_s14, 4  ;;  %s1893_s0 = sand.u32 1, %s1489_s30   ;;  %s1685_s12 = int_to_ptr.vmem [resolvable:$true] %s324_s12 }
  0x59   : > { %s314_s4 = scalar_lea.sflag [#allocation5], %s1893_s0  ;;  %s1415_s5 = scalar_lea.hbm %s1683_s17, 256 }
  0x5a   : > { %p1416_p2 = scmp.ne.s32.totalorder %s1683_s17, %s1415_s5  ;;  %s1420_s26 = scalar_lea.hbm %s1873_s1, 512 }
  0x5b   : > { %p1421_p1 = scmp.lt.s32.totalorder %s1683_s17, %s1873_s1  ;;  %p1422_p4 = scmp.lt.s32.totalorder %s1420_s26, %s1415_s5 }
  0x5c   : > { %p1418_p6 = pnand %p1416_p2, %p1389_p13 }
  0x5d   : > { %p1423_p8 = por %p1422_p4, %p1421_p1 }
  0x5e   : > { %p1419_p10 = pneg %p1418_p6 }
  0x60   : > { %p1424_p9 = pnand %p1423_p8, %p1419_p10 }
  0x62   : > { %1427 = shalt.err (!%p1424_p9)
}
  0x63   : > { %s1428_s0 = scalar_lea.vmem %s1685_s12, 256  ;;  %s1499_s30 = smov [#allocation4]  }
  0x64   : > { %p1429_p12 = scmp.ne.s32.totalorder %s1685_s12, %s1428_s0  ;;  %s1433_s22 = sshll.u32 %s1499_s30, 4  ;;  %s1434_s22 = int_to_ptr.vmem [resolvable:$false] %s1433_s22 }
  0x65   : > { %s1435_s23 = scalar_lea.vmem %s1434_s22, 512  ;;  %p1436_p3 = scmp.lt.s32.totalorder %s1685_s12, %s1434_s22 }
  0x66   : > { %p1431_p11 = pnand %p1429_p12, %p1389_p13  ;;  %p1437_p2 = scmp.lt.s32.totalorder %s1435_s23, %s1428_s0 }
  0x68   : > { %p1432_p0 = pneg %p1431_p11  ;;  %p1438_p6 = por %p1437_p2, %p1436_p3 }
  0x6a   : > { %p1439_p1 = pnand %p1438_p6, %p1432_p0 }
  0x6c   : > { %1442 = shalt.err (!%p1439_p1)
}
  0x6d   : > { %1253 = dma.hbm_to_vmem [thread:$0]  (!%p1643_p7), %s1683_s17, 256, %s1685_s12, %s314_s4, %s1497_s15, %s1497_s15, %s1498_s21  }
  0x6e   : > { %336 = sbr.rel (%p1580_p5) target bundleno = 617 (0x269), region = 52  ;;  %s338_s5 = sand.u32 (!%p1580_p5), 1, %s1481_s28  }
  0x6f   : > { %s1160_s25 = sshll.u32 (!%p1580_p5), %s338_s5, 5  ;;  %s339_s14 = scalar_lea.sflag (!%p1580_p5), [#allocation3], %s338_s5 }
  0x70   : > { %s342_s20 = scalar_lea.vmem (!%p1580_p5), [#allocation2], %s1160_s25  ;;  %p1894_p13 = scmp.ne.s32.totalorder (!%p1580_p5), %s1886_s10, 0 }
  0x73   : > { %1460 = dma.done.wait (%p1894_p13), %s339_s14, 512  }
  0x74   : > { %1462 = vsyncadd (%p1894_p13), %s339_s14, 4294966784  ;;  %s347_s27 = sand.u32 1, %s1568_s9   ;;  %s1161_s24 = sshll.u32 %s338_s5, 4 }
  0x75   : > { %s348_s26 = scalar_lea.sflag [#allocation5], %s347_s27  ;;  %s351_s4 = scalar_lea.vmem [#allocation4], %s1161_s24 }
  0x76   : > { %1464 = dma.done.wait (%p1894_p13), %s348_s26, 256  }
  0x77   : > { %1466 = vsyncadd (%p1894_p13), %s348_s26, 4294967040  ;;  %p1895_p5 = scmp.eq.s32.totalorder %s1568_s9, 0 }
  0x79   : > { %1468 = dma.done.wait (%p1895_p5), [#allocation5], 256   ;;  %p1896_p7 = pmov %p1895_p5 }
  0x7a   : > { %p1897_p10 = pmov %p1895_p5 }
  0x7b   : > { %1470 = vsyncadd (%p1896_p7), [#allocation5], 4294967040 }
  0x7c   : > { %1472 = dma.done.wait (%p1897_p10), [#allocation8], 48   ;;  %p1898_p4 = pmov %p1895_p5 }
  0x7d   : > { %v1305_v0 = vld [vmem:[%s1874_s2 + $0x8] sm:$0xff]   ;;  %v1306_v1 = vld [vmem:[%s1874_s2] sm:$0xff]   ;;  %vm439_vm0 = vcmask 261120   ;;  %v409_v4 = vld [vmem:[%s342_s20 + $0x10] sm:$0xff]  ;;  %v1500_v9 = vmov 0.0   ;;  %vm1501_vm1 = vmmov 0   ;;  %v576_v21 = vlaneseq }
  0x7e   : > { %1474 = vsyncadd (%p1898_p4), [#allocation8], 4294967248  ;;  %1205 = vmatprep.subr.bf16.mxu1 %v1305_v0  ;;  %v407_v2 = vld [vmem:[%s342_s20] sm:$0xff]  ;;  %v408_v3 = vld [vmem:[%s342_s20 + $0x8] sm:$0xff]  ;;  %v1502_v16 = vmov 0   ;;  %p402_p8 = scmp.lt.s32.totalorder %s1568_s9, 1 }
  0x7f   : > { %1206 = vmatpush3.bf16.msra.mxu1 %v1305_v0  ;;  %v411_v5 = vpack.c.bf16 %v408_v3, %v407_v2  ;;  %v410_v6 = vld [vmem:[%s342_s20 + $0x18] sm:$0xff]  ;;  %v1307_v8 = vld [vmem:[#allocation6 + $0x8] sm:$0xff]   ;;  %v1308_v10 = vld [vmem:[#allocation6] sm:$0xff]   ;;  %1304 = vset.pattern.permute.xlu0 %v1502_v16  ;;  %v1503_v19 = vmov 1966171168   ;;  %v577_v27 = vshrl.u32 %v576_v21, 7 }
  0x80   : > { %1207 = vmatprep.subr.bf16.mxu1 %v1306_v1  ;;  %v412_v7 = vpack.c.bf16 %v410_v6, %v409_v4  ;;  %v413_v11 = vld [vmem:[%s351_s4] sm:$0xff]  ;;  %v414_v12 = vld [vmem:[%s351_s4 + $0x8] sm:$0xff]  ;;  %v574_v20 = vunpack.c.l.s4 %v1503_v19  ;;  %s1904_s9 = smov (!%p402_p8, %s1568_s9), 1  ;;  %vm1027_vm2 = vcmask 1043456  }
  0x81   : > { %1209 = vmatprep.mubr.msk.bf16.mxu1 %vm439_vm0, %v411_v5  ;;  %v415_v13 = vpack.c.bf16 %v414_v12, %v413_v11  ;;  %v1743_v14 = vld [vmem:[#allocation9] sm:$0x3]  ;;  %v977_v15 = vld [vmem:[%s1879_s7] sm:$0xf]  ;;  %v1171_v42 = vld [vmem:[#allocation7] ss:$0 sm:$0xff] }
  0x82   : > { %1203 = vmatprep.mubr.bf16.mxu0 %v1743_v14  ;;  %980 = vperm.xlu0 %1304, %v977_v15   ;;  %v1166_v22 = vld [vmem:[%s1875_s3] ss:$0 sm:$0xff]  ;;  %v575_v26 = vunpack.c.0.s8 %v574_v20  ;;  %v1759_v47 = vsub.s32 0, %v577_v27  ;;  %s1165_s0 = sshll.u32 %s1904_s9, 3 }
  0x83   : > { %1208 = vmatpush3.bf16.msra.mxu1 %v1306_v1  ;;  %s405_s23 = scalar_lea.vmem %s1880_s8, %s1165_s0 }
  0x84   : > { %1213 = vmatprep.subr.bf16.mxu1 %v1500_v9  ;;  %v1752_v32 = vsub.s32 %v575_v26, %v577_v27 }
  0x86   : > { %1210 = vmatmul.mubr.msk.bf16.vlgmr.msra.gmra.mxu1 %vm439_vm0, %v412_v7 }
  0x87   : > { %1214 = vmatpush3.bf16.msra.mxu1 %v1307_v8  ;;  %1217 = vmatprep.mubr.msk.bf16.mxu1 %vm1501_vm1, %v1500_v9 }
  0x88   : > { %1215 = vmatprep.subr.bf16.mxu1 %v1500_v9 }
  0x8b   : > { %1216 = vmatpush3.bf16.msra.mxu1 %v1308_v10 }
  0x8e   : > { %1218 = vmatmul.mubr.msk.bf16.vlgmr.msra.gmra.mxu1 %vm439_vm0, %v415_v13 }
 0x146   : > { %v1211_v17 = vpop.f32.mrf.mxu1 }
 0x147   : > { %v489_v43 = vadd.f32 %v1211_v17, %v1166_v22 }
 0x148   : > { %v480_v18 = vpop.f32.mrf.mxu1 }
 0x149   : > { %v1762_v53 = vmax.f32 %v489_v43, 0.0  ;;  %v481_v6 = vadd.f32 %v1166_v22, %v480_v18 }
 0x14a   : > { %v1212_v23 = vpop.f32.mrf.mxu1 }
 0x14b   : > { %v492_v24 = vadd.f32 %v1212_v23, %v1166_v22  ;;  %v670_v10 = vcombine.high %v1762_v53, %v1762_v53  ;;  %v495_v18 = vmax.f32 %v481_v6, 0.0 }
 0x14c   : > { %v483_v25 = vpop.f32.mrf.mxu1 }
 0x14d   : > { %v498_v28 = vmax.f32 %v492_v24, 0.0  ;;  %v484_v30 = vadd.f32 %v1166_v22, %v483_v25  ;;  %v684_v22 = vrot.slane %v670_v10, %v1752_v32 }
 0x14e   : > { %v559_v29 = vpop.f32.mrf.mxu1 }
 0x14f   : > { %v719_v33 = vcombine.high %v498_v28, %v498_v28  ;;  %v496_v36 = vmax.f32 %v484_v30, 0.0  ;;  %v726_v38 = vrot.slane %v498_v28, %v1752_v32  ;;  %v560_v59 = vadd.f32 %v1171_v42, %v559_v29 }
 0x150   : > { %v1219_v31 = vpop.f32.mrf.mxu1  ;;  %v572_v28 = vcombine.high %v495_v18, %v495_v18 }
 0x151   : > { %v733_v35 = vrot.slane %v719_v33, %v1752_v32  ;;  %v621_v41 = vcombine.high %v496_v36, %v496_v36  ;;  %v734_v48 = vcombine.high %v726_v38, %v726_v38  ;;  %v628_v57 = vrot.slane %v496_v36, %v1752_v32 }
 0x152   : > { %v562_v34 = vpop.f32.mrf.mxu1  ;;  %v742_v3 = vrot.slane %v726_v38, %v1752_v32  ;;  %v1777_v8 = vmax.f32 %v560_v59, 0.0  ;;  %v686_v31 = vcombine.high %v684_v22, %v684_v22 }
 0x153   : > { %v735_v39 = vcombine.high %v733_v35, %v733_v35  ;;  %v749_v40 = vrot.slane %v733_v35, %v1752_v32  ;;  %v563_v44 = vadd.f32 %v1171_v42, %v562_v34  ;;  %v635_v46 = vrot.slane %v621_v41, %v1752_v32 }
 0x154   : > { %v1220_v37 = vpop.f32.mrf.mxu1  ;;  %v756_v61 = vrot.slane %v734_v48, %v1752_v32  ;;  %v636_v7 = vcombine.high %v628_v57, %v628_v57  ;;  %v764_v16 = vcombine.high %v742_v3, %v742_v3  ;;  %v644_v25 = vrot.slane %v628_v57, %v1752_v32 }
 0x155   : > { %v763_v45 = vrot.slane %v735_v39, %v1752_v32  ;;  %v765_v49 = vcombine.high %v749_v40, %v749_v40  ;;  %v637_v51 = vcombine.high %v635_v46, %v635_v46  ;;  %v651_v52 = vrot.slane %v635_v46, %v1752_v32 }
 0x156   : > { %v1764_v54 = vmax.f32 %v563_v44, 0.0  ;;  %v883_v5 = vrot.slane %v749_v40, %v1759_v47  ;;  %v766_v11 = vcombine.high %v756_v61, %v756_v61  ;;  %v658_v19 = vrot.slane %v636_v7, %v1752_v32 }
 0x157   : > { %v767_v50 = vcombine.high %v763_v45, %v763_v45  ;;  %v891_v55 = vrot.slane %v765_v49, %v1759_v47  ;;  %v665_v58 = vrot.slane %v637_v51, %v1752_v32  ;;  %v667_v60 = vcombine.high %v651_v52, %v651_v52 }
 0x158   : > { %v887_v0 = vrot.slane %v763_v45, %v1759_v47  ;;  %v956_v17 = vmul.f32 %v883_v5, %v1764_v54  ;;  %v879_v24 = vrot.slane %v766_v11, %v1759_v47  ;;  %v819_v26 = vrot.slane %v651_v52, %v1759_v47 }
 0x159   : > { %v895_v56 = vrot.slane %v767_v50, %v1759_v47  ;;  %v958_v62 = vmul.f32 %v891_v55, %v1764_v54  ;;  %v669_v1 = vcombine.high %v665_v58, %v665_v58  ;;  %v827_v2 = vrot.slane %v667_v60, %v1759_v47 }
 0x15a   : > { %v957_v12 = vmul.f32 %v887_v0, %v1764_v54  ;;  %v823_v21 = vrot.slane %v665_v58, %v1759_v47  ;;  %v875_v27 = vrot.slane %v764_v16, %v1759_v47  ;;  %v668_v29 = vcombine.high %v658_v19, %v658_v19 }
 0x15b   : > { %v959_v63 = vmul.f32 %v895_v56, %v1764_v54  ;;  %v831_v9 = vrot.slane %v669_v1, %v1759_v47  ;;  %v942_v13 = vmul.f32 %v827_v2, %v1777_v8  ;;  %v955_v33 = vmul.f32 %v879_v24, %v1764_v54 }
 0x15c   : > { %v974_v23 = vpack.c.bf16 %v957_v12, %v956_v17  ;;  %v941_v30 = vmul.f32 %v823_v21, %v1777_v8  ;;  %v666_v34 = vcombine.high %v644_v25, %v644_v25  ;;  %v940_v35 = vmul.f32 %v819_v26, %v1777_v8 }
 0x15d   : > { %v975_v4 = vpack.c.bf16 %v959_v63, %v958_v62  ;;  %v943_v15 = vmul.f32 %v831_v9, %v1777_v8  ;;  %v954_v36 = vmul.f32 %v875_v27, %v1764_v54  ;;  %v586_v37 = vrot.slane %v572_v28, %v1752_v32 }
 0x15e   : > { %v966_v38 = vpack.c.bf16 %v941_v30, %v940_v35  ;;  %v815_v39 = vrot.slane %v668_v29, %v1759_v47  ;;  %v714_v40 = vrot.slane %v686_v31, %v1752_v32  ;;  %v871_v42 = vrot.slane %v756_v61, %v1759_v47 }
 0x15f   : > { %1187 = vmatprep.subr.bf16.mxu0 %v975_v4  ;;  %v967_v20 = vpack.c.bf16 %v943_v15, %v942_v13  ;;  %v973_v41 = vpack.c.bf16 %v955_v33, %v954_v36  ;;  %v811_v43 = vrot.slane %v666_v34, %v1759_v47  ;;  %v700_v44 = vrot.slane %v684_v22, %v1752_v32 }
 0x160   : > { %v867_v45 = vrot.slane %v742_v3, %v1759_v47  ;;  %v588_v46 = vcombine.high %v586_v37, %v586_v37  ;;  %v939_v48 = vmul.f32 %v815_v39, %v1777_v8  ;;  %v953_v50 = vmul.f32 %v871_v42, %v1764_v54 }
 0x161   : > { %1188 = vmatpush3.bf16.xpose.msra.mxu0 %v967_v20  ;;  %v718_v51 = vcombine.high %v714_v40, %v714_v40  ;;  %v938_v52 = vmul.f32 %v811_v43, %v1777_v8  ;;  %v716_v55 = vcombine.high %v700_v44, %v700_v44  ;;  %v807_v58 = vrot.slane %v658_v19, %v1759_v47 }
 0x162   : > { %1189 = vmatprep.subr.bf16.mxu0 %v974_v23  ;;  %v952_v49 = vmul.f32 %v867_v45, %v1764_v54  ;;  %v616_v56 = vrot.slane %v588_v46, %v1752_v32  ;;  %v602_v61 = vrot.slane %v586_v37, %v1752_v32  ;;  %v803_v62 = vrot.slane %v644_v25, %v1759_v47 }
 0x163   : > { %v965_v57 = vpack.c.bf16 %v939_v48, %v938_v52  ;;  %v863_v60 = vrot.slane %v718_v51, %v1759_v47  ;;  %v677_v63 = vrot.slane %v1762_v53, %v1752_v32  ;;  %v859_v0 = vrot.slane %v716_v55, %v1759_v47 }
 0x164   : > { %v972_v59 = vpack.c.bf16 %v953_v50, %v952_v49  ;;  %v937_v1 = vmul.f32 %v807_v58, %v1777_v8  ;;  %v620_v2 = vcombine.high %v616_v56, %v616_v56  ;;  %v618_v5 = vcombine.high %v602_v61, %v602_v61 }
 0x165   : > { %v950_v3 = vmul.f32 %v859_v0, %v1764_v54  ;;  %v951_v4 = vmul.f32 %v863_v60, %v1764_v54  ;;  %v936_v6 = vmul.f32 %v803_v62, %v1777_v8  ;;  %v685_v7 = vcombine.high %v677_v63, %v677_v63 }
 0x166   : > { %v579_v9 = vrot.slane %v495_v18, %v1752_v32  ;;  %v799_v11 = vrot.slane %v620_v2, %v1759_v47  ;;  %v795_v12 = vrot.slane %v618_v5, %v1759_v47  ;;  %v693_v13 = vrot.slane %v677_v63, %v1752_v32 }
 0x167   : > { %v964_v10 = vpack.c.bf16 %v937_v1, %v936_v6  ;;  %v971_v53 = vpack.c.bf16 %v951_v4, %v950_v3  ;;  %v707_v15 = vrot.slane %v685_v7, %v1752_v32  ;;  %v851_v16 = vrot.slane %v700_v44, %v1759_v47 }
 0x168   : > { %v855_v17 = vrot.slane %v714_v40, %v1759_v47  ;;  %v587_v19 = vcombine.high %v579_v9, %v579_v9  ;;  %v935_v20 = vmul.f32 %v799_v11, %v1777_v8  ;;  %v934_v22 = vmul.f32 %v795_v12, %v1777_v8 }
 0x169   : > { %1190 = vmatpush3.bf16.xpose.msra.mxu0 %v966_v38  ;;  %v948_v18 = vmul.f32 %v851_v16, %v1764_v54  ;;  %v715_v23 = vcombine.high %v693_v13, %v693_v13  ;;  %v717_v24 = vcombine.high %v707_v15, %v707_v15  ;;  %v791_v27 = vrot.slane %v616_v56, %v1759_v47 }
 0x16a   : > { %1191 = vmatprep.subr.bf16.mxu0 %v973_v41  ;;  %v949_v21 = vmul.f32 %v855_v17, %v1764_v54  ;;  %v609_v25 = vrot.slane %v587_v19, %v1752_v32  ;;  %v963_v26 = vpack.c.bf16 %v935_v20, %v934_v22  ;;  %v595_v29 = vrot.slane %v579_v9, %v1752_v32 }
 0x16b   : > { %v787_v30 = vrot.slane %v602_v61, %v1759_v47  ;;  %v843_v31 = vrot.slane %v715_v23, %v1759_v47  ;;  %v847_v33 = vrot.slane %v717_v24, %v1759_v47  ;;  %v933_v35 = vmul.f32 %v791_v27, %v1777_v8 }
 0x16c   : > { %v970_v28 = vpack.c.bf16 %v949_v21, %v948_v18  ;;  %v619_v34 = vcombine.high %v609_v25, %v609_v25  ;;  %v617_v38 = vcombine.high %v595_v29, %v595_v29  ;;  %v835_v43 = vrot.slane %v693_v13, %v1759_v47 }
 0x16d   : > { %v946_v36 = vmul.f32 %v843_v31, %v1764_v54  ;;  %v947_v37 = vmul.f32 %v847_v33, %v1764_v54  ;;  %v932_v39 = vmul.f32 %v787_v30, %v1777_v8  ;;  %v839_v44 = vrot.slane %v707_v15, %v1759_v47 }
 0x16e   : > { %v783_v32 = vrot.slane %v619_v34, %v1759_v47  ;;  %v779_v42 = vrot.slane %v617_v38, %v1759_v47  ;;  %v944_v46 = vmul.f32 %v835_v43, %v1764_v54  ;;  %v775_v51 = vrot.slane %v609_v25, %v1759_v47 }
 0x16f   : > { %v962_v40 = vpack.c.bf16 %v933_v35, %v932_v39  ;;  %v969_v41 = vpack.c.bf16 %v947_v37, %v946_v36  ;;  %v945_v48 = vmul.f32 %v839_v44, %v1764_v54  ;;  %v771_v55 = vrot.slane %v595_v29, %v1759_v47 }
 0x170   : > { %v931_v45 = vmul.f32 %v783_v32, %v1777_v8  ;;  %v930_v49 = vmul.f32 %v779_v42, %v1777_v8  ;;  %v929_v56 = vmul.f32 %v775_v51, %v1777_v8 }
 0x171   : > { %1192 = vmatpush3.bf16.xpose.msra.mxu0 %v965_v57  ;;  %v968_v52 = vpack.c.bf16 %v945_v48, %v944_v46  ;;  %v928_v57 = vmul.f32 %v771_v55, %v1777_v8 }
 0x172   : > { %1193 = vmatprep.subr.bf16.mxu0 %v972_v59  ;;  %v961_v50 = vpack.c.bf16 %v931_v45, %v930_v49  ;;  %v981_v59 = vpop.permute.xlu0 %980 }
 0x173   : > { %v960_v58 = vpack.c.bf16 %v929_v56, %v928_v57 }
 0x179   : > { %1194 = vmatpush3.bf16.xpose.msra.mxu0 %v964_v10 }
 0x17a   : > { %1195 = vmatprep.subr.bf16.mxu0 %v971_v53 }
 0x181   : > { %1196 = vmatpush3.bf16.xpose.msra.mxu0 %v963_v26 }
 0x182   : > { %1197 = vmatprep.subr.bf16.mxu0 %v970_v28 }
 0x189   : > { %1198 = vmatpush3.bf16.xpose.msra.mxu0 %v962_v40 }
 0x18a   : > { %1199 = vmatprep.subr.bf16.mxu0 %v969_v41 }
 0x191   : > { %1200 = vmatpush3.bf16.xpose.msra.mxu0 %v961_v50 }
 0x192   : > { %1201 = vmatprep.subr.bf16.mxu0 %v968_v52 }
 0x199   : > { %1202 = vmatpush3.bf16.xpose.msra.mxu0 %v960_v58 }
 0x1a0   : > { %1204 = vmatmul.mubr.bf16.vlgmr.msra.gmra.mxu0 %v1743_v14 }
 0x260   : > { %v1017_v54 = vpop.f32.mrf.mxu0 }
 0x261   : > { %v1018_v47 = vadd.f32 %v1017_v54, %v981_v59 }
 0x262   : > { %v1019_v60 = vpop.f32.mrf.mxu0 }
 0x263   : > { %v1020_v61 = vadd.f32 %v1019_v60, %v981_v59 }
 0x264   : > { %v1021_v62 = vpop.f32.mrf.mxu0 }
 0x265   : > { %v1025_v63 = vrot.slane %v1020_v61, 4 }
 0x266   : > { %v1022_v8 = vpop.f32.mrf.mxu0 }
 0x267   : > { %v1028_v0 = vsel %vm1027_vm2, %v1018_v47, %v1025_v63 }
 0x268   : > { %1029 = vst [vmem:[%s405_s23] sm:$0xff] %v1028_v0 }
 0x269 PF: > { %p22_p9 = scmp.ge.s32.totalorder %s1619_s16, 4   ;;  %s1899_s27 = smov %s1481_s28 }
 0x26a   : > { %s1900_s28 = smov %s1485_s29  ;;  %s1901_s29 = smov %s1629_s19 }
 0x26b   : > { %s1902_s30 = smov %s1619_s16  ;;  %24 = sbr.rel (!%p22_p9) target bundleno = 10 (0xa), region = 117 }
 0x270   :  { %1049 = vsyncpa [#allocation3], 1 }
 0x271   :  { %1051 = vsyncpa [#allocation3 + $0x1], 1 }
 0x272   :  { %1052 = vsyncpa [#allocation5], 1 }
 0x273   :  { %1054 = vsyncpa [#allocation5 + $0x1], 1 }
 0x274   :  { %1055 = vsyncpa [#allocation8], 1 }

</bundles_post_ra>
